<compile_context>
chip_gen: v5e
topology: v5e:2x2
jax: 0.10.0
libtpu: 0.0.40
codegen_flags: <defaults>
</compile_context>

<pallas_src>
import functools

import jax
import jax.numpy as jnp
from jax.experimental import pallas as pl
from jax.experimental.pallas import tpu as pltpu

NEG_SLOPE = 0.01  # F.leaky_relu default
BN_EPS = 1e-5
LANE = 128


def _leaky_relu(x):
    return jnp.where(x > 0, x, NEG_SLOPE * x)


def _residual_block_kernel(x_ref, w_ref, b_ref, o_ref, *, l_per_sample):
    """x_ref: (R, Cp) f32, R = batch_tile * L (channels on lanes, rows flattened).
    w_ref: (2, 3, Cp, Cp) bf16 folded conv+BN weights (conv, tap, C_in, C_out).
    b_ref: (2, Cp) f32 folded biases."""
    x = x_ref[...]                                   # (R, Cp) f32
    rows = x.shape[0]
    L = l_per_sample

    # Sample-boundary masks on (R, 1): the conv's zero padding == drop the rolled-in
    # row at each sample edge of the row-flattened layout.
    phase = jax.lax.broadcasted_iota(jnp.int32, (rows, 1), 0) % L
    first_row = phase == 0
    last_row = phase == (L - 1)

    def conv_k3(v, ci):
        # out[r] = v[r-1] @ W[0] + v[r] @ W[1] + v[r+1] @ W[2] + bias
        # Three K=Cp bf16 matmuls (f32 accumulation); the +-1 shifts are applied to
        # the per-tap f32 outputs via XLU roll + boundary mask (no 3x-K concat).
        v16 = v.astype(jnp.bfloat16)
        t_prev = jnp.dot(v16, w_ref[ci, 0], preferred_element_type=jnp.float32)
        t_mid = jnp.dot(v16, w_ref[ci, 1], preferred_element_type=jnp.float32)
        t_next = jnp.dot(v16, w_ref[ci, 2], preferred_element_type=jnp.float32)
        out = t_mid + b_ref[ci:ci + 1, :]
        out = out + jnp.where(first_row, 0.0, pltpu.roll(t_prev, 1, axis=0))
        out = out + jnp.where(last_row, 0.0, pltpu.roll(t_next, rows - 1, axis=0))
        return out

    # conv1 (+ folded bn1) -> leaky_relu
    y = _leaky_relu(conv_k3(x, 0))
    # conv2 (+ folded bn2) -> residual add -> leaky_relu
    z = conv_k3(y, 1)
    o_ref[...] = _leaky_relu(z + x).astype(o_ref.dtype)


def _fold_bn(w, b, g, beta, m, v, c, cp):
    """Fold eval-mode BN into the conv: w' = w * s (over C_out), b' = b*s + (beta - m*s).
    Returns per-tap (3, cp, cp) bf16 matmul weights and a (cp,) f32 bias."""
    s = g / jnp.sqrt(v + BN_EPS)
    w_t = jnp.transpose(w, (2, 1, 0)).astype(jnp.float32) * s[None, None, :]  # (3, Cin, Cout)
    b_f = (b * s + (beta - m * s)).astype(jnp.float32)
    w_t = jnp.pad(w_t, ((0, 0), (0, cp - c), (0, cp - c)))
    b_f = jnp.pad(b_f, (0, cp - c))
    return w_t.astype(jnp.bfloat16), b_f


def _hw_params():
    """(target block bytes, vmem_limit_bytes, min grid steps) per TPU generation."""
    kind = ""
    try:
        kind = jax.devices()[0].device_kind.lower()
    except Exception:
        pass
    if "v7" in kind or "7x" in kind:
        # 64 MiB VMEM per TC, 2 TCs: smaller blocks, headroom, >=4 parallel steps.
        return 3 << 20, 48 << 20, 4
    if "v6" in kind or "v5" in kind:
        return 6 << 20, 96 << 20, 2
    return 4 << 20, 48 << 20, 2   # unknown: conservative (fits every gen)


def _pick_channel_pad(c):
    """Lane-pad channels to a multiple of 128 only when the HBM overhead is <=25%."""
    if c % LANE == 0:
        return c
    cp = ((c + LANE - 1) // LANE) * LANE
    return cp if cp * 4 <= c * 5 else c


def _pick_batch_tile(n, l, cp, target_bytes, min_steps):
    """Largest batch tile under target_bytes, keeping >= min_steps grid steps and an
    8-aligned (or full) sublane dimension."""
    bytes_per_sample = l * cp * 4
    nb = int(max(1, min(n, target_bytes // max(1, bytes_per_sample))))
    nb = min(nb, max(1, n // max(1, min_steps)))
    while nb > 1 and (n % nb != 0 or (nb * l) % 8 != 0):
        nb -= 1
    if n % nb != 0 or ((nb * l) % 8 != 0 and nb != n):
        nb = n
    return nb


@jax.jit
def residual_block(x_ncl, w1, b1, g1, beta1, m1, v1, w2, b2, g2, beta2, m2, v2):
    """x_ncl: (N, C, L) float32 (PyTorch NCL). Conv weights w*: (C_out, C_in, 3)."""
    N, C, L = x_ncl.shape
    Cp = _pick_channel_pad(C)

    w1_t, b1_f = _fold_bn(w1, b1, g1, beta1, m1, v1, C, Cp)
    w2_t, b2_f = _fold_bn(w2, b2, g2, beta2, m2, v2, C, Cp)
    w_all = jnp.stack([w1_t, w2_t])                  # (2, 3, Cp, Cp) bf16
    b_all = jnp.stack([b1_f, b2_f])                  # (2, Cp) f32

    # Channels-last, batch-flattened rows; (optional) zero-padded channels stay
    # exactly zero through the whole block and are sliced off afterwards.
    x_rows = jnp.transpose(x_ncl, (0, 2, 1)).astype(jnp.float32).reshape(N * L, C)
    if Cp != C:
        x_rows = jnp.pad(x_rows, ((0, 0), (0, Cp - C)))

    target_bytes, vmem_limit, min_steps = _hw_params()
    nb = _pick_batch_tile(N, L, Cp, target_bytes, min_steps)
    rows_per_block = nb * L
    grid = (N // nb,)

    kernel = functools.partial(_residual_block_kernel, l_per_sample=L)

    out = pl.pallas_call(
        kernel,
        out_shape=jax.ShapeDtypeStruct((N * L, Cp), jnp.float32),
        grid=grid,
        in_specs=[
            pl.BlockSpec((rows_per_block, Cp), lambda i: (i, 0)),    # activations
            pl.BlockSpec((2, 3, Cp, Cp), lambda i: (0, 0, 0, 0)),    # weights (block-invariant)
            pl.BlockSpec((2, Cp), lambda i: (0, 0)),                 # biases (block-invariant)
        ],
        out_specs=pl.BlockSpec((rows_per_block, Cp), lambda i: (i, 0)),
        compiler_params=pltpu.CompilerParams(
            dimension_semantics=("parallel",),
            vmem_limit_bytes=vmem_limit,
        ),
    )(x_rows, w_all, b_all)

    if Cp != C:
        out = out[:, :C]
    out = out.reshape(N, L, C)
    return jnp.transpose(out, (0, 2, 1))  # back to (N, C, L)


def _reference(x_ncl, w1, b1, g1, beta1, m1, v1, w2, b2, g2, beta2, m2, v2):
    """Pure-JAX f32 reference mirroring the PyTorch forward (eval-mode BN)."""
    def conv1d(x, w, b):  # x: (N, C_in, L), w: (C_out, C_in, 3)
        y = jax.lax.conv_general_dilated(
            x, w, window_strides=(1,), padding=((1, 1),),
            dimension_numbers=("NCH", "OIH", "NCH"))
        return y + b[None, :, None]

    def bn(x, g, beta, m, v):
        return (x - m[None, :, None]) / jnp.sqrt(v[None, :, None] + BN_EPS) \
            * g[None, :, None] + beta[None, :, None]

    res = x_ncl
    x = _leaky_relu(bn(conv1d(x_ncl, w1, b1), g1, beta1, m1, v1))
    x = bn(conv1d(x, w2, b2), g2, beta2, m2, v2)
    x = _leaky_relu(x + res)
    return x


if __name__ == "__main__":
    N, C, L = 2, 8, 16  # in_channels == out_channels (required by the residual add)

    key = jax.random.PRNGKey(0)
    ks = jax.random.split(key, 12)

    x = jax.random.normal(ks[0], (N, C, L), dtype=jnp.float32)

    w1 = 0.2 * jax.random.normal(ks[1], (C, C, 3), dtype=jnp.float32)
    b1 = 0.1 * jax.random.normal(ks[2], (C,), dtype=jnp.float32)
    g1 = 1.0 + 0.1 * jax.random.normal(ks[3], (C,), dtype=jnp.float32)
    beta1 = 0.1 * jax.random.normal(ks[4], (C,), dtype=jnp.float32)
    m1 = 0.05 * jax.random.normal(ks[5], (C,), dtype=jnp.float32)
    v1 = 1.0 + 0.1 * jax.nn.softplus(jax.random.normal(ks[6], (C,), dtype=jnp.float32))

    w2 = 0.2 * jax.random.normal(ks[7], (C, C, 3), dtype=jnp.float32)
    b2 = 0.1 * jax.random.normal(ks[8], (C,), dtype=jnp.float32)
    g2 = 1.0 + 0.1 * jax.random.normal(ks[9], (C,), dtype=jnp.float32)
    beta2 = 0.1 * jax.random.normal(ks[10], (C,), dtype=jnp.float32)
    m2 = 0.05 * jax.random.normal(ks[11], (C,), dtype=jnp.float32)
    v2 = 1.0 + 0.1 * jax.nn.softplus(m2 * 3.0)

    params = (w1, b1, g1, beta1, m1, v1, w2, b2, g2, beta2, m2, v2)

    out = residual_block(x, *params)
    out = jax.block_until_ready(out)

    ref = _reference(x, *params)
    assert out.shape == (N, C, L), out.shape
    # bf16 MXU operands (f32 accumulation) -> compare against the f32 reference with
    # a bf16-appropriate tolerance.
    assert jnp.allclose(out, ref, atol=3e-2, rtol=3e-2), \
        float(jnp.max(jnp.abs(out - ref)))

    print("KERNEL_OK")
</pallas_src>

<mosaic_0001>
module attributes {stable_mosaic.version = 11 : i64} {
  func.func @_residual_block_kernel(%arg0: i32, %arg1: memref<16x8xf32, #tpu.memory_space<vmem>>, %arg2: memref<2x3x8x8xbf16, #tpu.memory_space<vmem>>, %arg3: memref<2x8xf32, #tpu.memory_space<vmem>>, %arg4: memref<16x8xf32, #tpu.memory_space<vmem>>) attributes {dimension_semantics = [#tpu.dimension_semantics<parallel>], iteration_bounds = array<i64: 2>, scalar_prefetch = 0 : i64, scratch_operands = 0 : i64, tpu.core_type = #tpu.core_type<tc>, window_params = [{transform_indices = @transform_0, window_bounds = array<i64: 16, 8>}, {pipeline_mode = #tpu.pipeline_mode<synchronous>, transform_indices = @transform_1, window_bounds = array<i64: 2, 3, 8, 8>}, {pipeline_mode = #tpu.pipeline_mode<synchronous>, transform_indices = @transform_2, window_bounds = array<i64: 2, 8>}, {transform_indices = @transform_3, window_bounds = array<i64: 16, 8>}]} {
    %c0 = arith.constant 0 : index
    %c0_0 = arith.constant 0 : index
    %0 = vector.load %arg1[%c0, %c0_0] : memref<16x8xf32, #tpu.memory_space<vmem>>, vector<16x8xf32>
    %1 = tpu.iota {dimensions = array<i32: 0>} : vector<16x1xi32>
    %c16_i32 = arith.constant 16 : i32
    %c0_i32 = arith.constant 0 : i32
    %2 = arith.cmpi eq, %c16_i32, %c0_i32 : i32
    %c1_i32 = arith.constant 1 : i32
    %3 = arith.select %2, %c1_i32, %c16_i32 : i32
    %4 = vector.broadcast %3 : i32 to vector<16x1xi32>
    %5 = arith.remsi %1, %4 : vector<16x1xi32>
    %c0_i32_1 = arith.constant 0 : i32
    %6 = vector.broadcast %c0_i32_1 : i32 to vector<16x1xi32>
    %7 = arith.cmpi ne, %5, %6 : vector<16x1xi32>
    %c0_i32_2 = arith.constant 0 : i32
    %8 = vector.broadcast %c0_i32_2 : i32 to vector<16x1xi32>
    %9 = arith.cmpi slt, %5, %8 : vector<16x1xi32>
    %c0_i32_3 = arith.constant 0 : i32
    %10 = arith.cmpi slt, %3, %c0_i32_3 : i32
    %11 = vector.broadcast %10 : i1 to vector<16x1xi1>
    %12 = vector.broadcast %11 : vector<16x1xi1> to vector<16x1xi1>
    %13 = arith.xori %9, %12 : vector<16x1xi1>
    %14 = arith.andi %13, %7 : vector<16x1xi1>
    %15 = vector.broadcast %3 : i32 to vector<16x1xi32>
    %16 = arith.addi %5, %15 : vector<16x1xi32>
    %17 = arith.select %14, %16, %5 : vector<16x1xi1>, vector<16x1xi32>
    %c0_i32_4 = arith.constant 0 : i32
    %18 = vector.broadcast %c0_i32_4 : i32 to vector<16x1xi32>
    %19 = arith.cmpi eq, %17, %18 : vector<16x1xi32>
    %c15_i32 = arith.constant 15 : i32
    %20 = vector.broadcast %c15_i32 : i32 to vector<16x1xi32>
    %21 = arith.cmpi eq, %17, %20 : vector<16x1xi32>
    %22 = arith.truncf %0 : vector<16x8xf32> to vector<16x8xbf16>
    %c0_5 = arith.constant 0 : index
    %c0_6 = arith.constant 0 : index
    %c0_7 = arith.constant 0 : index
    %c0_8 = arith.constant 0 : index
    %23 = vector.load %arg2[%c0_5, %c0_6, %c0_7, %c0_8] : memref<2x3x8x8xbf16, #tpu.memory_space<vmem>>, vector<1x1x8x8xbf16>
    %24 = vector.shape_cast %23 : vector<1x1x8x8xbf16> to vector<8x8xbf16>
    %cst = arith.constant dense<0.000000e+00> : vector<16x8xf32>
    %25 = tpu.matmul %22, %24, %cst {dimension_numbers = #tpu.dot_dimension_numbers<[1], [0], [0], [1], [0, 0, 1, 1], [], []>} : vector<16x8xbf16>, vector<8x8xbf16>, vector<16x8xf32> -> vector<16x8xf32>
    %c0_9 = arith.constant 0 : index
    %c1 = arith.constant 1 : index
    %c0_10 = arith.constant 0 : index
    %c0_11 = arith.constant 0 : index
    %26 = vector.load %arg2[%c0_9, %c1, %c0_10, %c0_11] : memref<2x3x8x8xbf16, #tpu.memory_space<vmem>>, vector<1x1x8x8xbf16>
    %27 = vector.shape_cast %26 : vector<1x1x8x8xbf16> to vector<8x8xbf16>
    %cst_12 = arith.constant dense<0.000000e+00> : vector<16x8xf32>
    %28 = tpu.matmul %22, %27, %cst_12 {dimension_numbers = #tpu.dot_dimension_numbers<[1], [0], [0], [1], [0, 0, 1, 1], [], []>} : vector<16x8xbf16>, vector<8x8xbf16>, vector<16x8xf32> -> vector<16x8xf32>
    %c0_13 = arith.constant 0 : index
    %c2 = arith.constant 2 : index
    %c0_14 = arith.constant 0 : index
    %c0_15 = arith.constant 0 : index
    %29 = vector.load %arg2[%c0_13, %c2, %c0_14, %c0_15] : memref<2x3x8x8xbf16, #tpu.memory_space<vmem>>, vector<1x1x8x8xbf16>
    %30 = vector.shape_cast %29 : vector<1x1x8x8xbf16> to vector<8x8xbf16>
    %cst_16 = arith.constant dense<0.000000e+00> : vector<16x8xf32>
    %31 = tpu.matmul %22, %30, %cst_16 {dimension_numbers = #tpu.dot_dimension_numbers<[1], [0], [0], [1], [0, 0, 1, 1], [], []>} : vector<16x8xbf16>, vector<8x8xbf16>, vector<16x8xf32> -> vector<16x8xf32>
    %c0_17 = arith.constant 0 : index
    %c0_18 = arith.constant 0 : index
    %32 = vector.load %arg3[%c0_17, %c0_18] : memref<2x8xf32, #tpu.memory_space<vmem>>, vector<1x8xf32>
    %33 = vector.broadcast %32 : vector<1x8xf32> to vector<16x8xf32>
    %34 = arith.addf %28, %33 : vector<16x8xf32>
    %c1_i32_19 = arith.constant 1 : i32
    %35 = tpu.dynamic_rotate %25 by %c1_i32_19 dim 0 : vector<16x8xf32>, i32 -> vector<16x8xf32>
    %cst_20 = arith.constant 0.000000e+00 : f32
    %36 = vector.shape_cast %19 : vector<16x1xi1> to vector<16x1xi1>
    %37 = vector.broadcast %36 : vector<16x1xi1> to vector<16x8xi1>
    %38 = vector.broadcast %cst_20 : f32 to vector<16x8xf32>
    %39 = arith.select %37, %38, %35 : vector<16x8xi1>, vector<16x8xf32>
    %40 = arith.addf %34, %39 : vector<16x8xf32>
    %c15_i32_21 = arith.constant 15 : i32
    %41 = tpu.dynamic_rotate %31 by %c15_i32_21 dim 0 : vector<16x8xf32>, i32 -> vector<16x8xf32>
    %cst_22 = arith.constant 0.000000e+00 : f32
    %42 = vector.shape_cast %21 : vector<16x1xi1> to vector<16x1xi1>
    %43 = vector.broadcast %42 : vector<16x1xi1> to vector<16x8xi1>
    %44 = vector.broadcast %cst_22 : f32 to vector<16x8xf32>
    %45 = arith.select %43, %44, %41 : vector<16x8xi1>, vector<16x8xf32>
    %46 = arith.addf %40, %45 : vector<16x8xf32>
    %cst_23 = arith.constant 0.000000e+00 : f32
    %47 = vector.broadcast %cst_23 : f32 to vector<16x8xf32>
    %48 = arith.cmpf ogt, %46, %47 : vector<16x8xf32>
    %cst_24 = arith.constant 0.00999999977 : f32
    %49 = vector.broadcast %cst_24 : f32 to vector<16x8xf32>
    %50 = arith.mulf %49, %46 : vector<16x8xf32>
    %51 = arith.select %48, %46, %50 : vector<16x8xi1>, vector<16x8xf32>
    %52 = arith.truncf %51 : vector<16x8xf32> to vector<16x8xbf16>
    %c1_25 = arith.constant 1 : index
    %c0_26 = arith.constant 0 : index
    %c0_27 = arith.constant 0 : index
    %c0_28 = arith.constant 0 : index
    %53 = vector.load %arg2[%c1_25, %c0_26, %c0_27, %c0_28] : memref<2x3x8x8xbf16, #tpu.memory_space<vmem>>, vector<1x1x8x8xbf16>
    %54 = vector.shape_cast %53 : vector<1x1x8x8xbf16> to vector<8x8xbf16>
    %cst_29 = arith.constant dense<0.000000e+00> : vector<16x8xf32>
    %55 = tpu.matmul %52, %54, %cst_29 {dimension_numbers = #tpu.dot_dimension_numbers<[1], [0], [0], [1], [0, 0, 1, 1], [], []>} : vector<16x8xbf16>, vector<8x8xbf16>, vector<16x8xf32> -> vector<16x8xf32>
    %c1_30 = arith.constant 1 : index
    %c1_31 = arith.constant 1 : index
    %c0_32 = arith.constant 0 : index
    %c0_33 = arith.constant 0 : index
    %56 = vector.load %arg2[%c1_30, %c1_31, %c0_32, %c0_33] : memref<2x3x8x8xbf16, #tpu.memory_space<vmem>>, vector<1x1x8x8xbf16>
    %57 = vector.shape_cast %56 : vector<1x1x8x8xbf16> to vector<8x8xbf16>
    %cst_34 = arith.constant dense<0.000000e+00> : vector<16x8xf32>
    %58 = tpu.matmul %52, %57, %cst_34 {dimension_numbers = #tpu.dot_dimension_numbers<[1], [0], [0], [1], [0, 0, 1, 1], [], []>} : vector<16x8xbf16>, vector<8x8xbf16>, vector<16x8xf32> -> vector<16x8xf32>
    %c1_35 = arith.constant 1 : index
    %c2_36 = arith.constant 2 : index
    %c0_37 = arith.constant 0 : index
    %c0_38 = arith.constant 0 : index
    %59 = vector.load %arg2[%c1_35, %c2_36, %c0_37, %c0_38] : memref<2x3x8x8xbf16, #tpu.memory_space<vmem>>, vector<1x1x8x8xbf16>
    %60 = vector.shape_cast %59 : vector<1x1x8x8xbf16> to vector<8x8xbf16>
    %cst_39 = arith.constant dense<0.000000e+00> : vector<16x8xf32>
    %61 = tpu.matmul %52, %60, %cst_39 {dimension_numbers = #tpu.dot_dimension_numbers<[1], [0], [0], [1], [0, 0, 1, 1], [], []>} : vector<16x8xbf16>, vector<8x8xbf16>, vector<16x8xf32> -> vector<16x8xf32>
    %c1_40 = arith.constant 1 : index
    %c0_41 = arith.constant 0 : index
    %62 = vector.load %arg3[%c1_40, %c0_41] : memref<2x8xf32, #tpu.memory_space<vmem>>, vector<1x8xf32>
    %63 = vector.broadcast %62 : vector<1x8xf32> to vector<16x8xf32>
    %64 = arith.addf %58, %63 : vector<16x8xf32>
    %c1_i32_42 = arith.constant 1 : i32
    %65 = tpu.dynamic_rotate %55 by %c1_i32_42 dim 0 : vector<16x8xf32>, i32 -> vector<16x8xf32>
    %cst_43 = arith.constant 0.000000e+00 : f32
    %66 = vector.shape_cast %19 : vector<16x1xi1> to vector<16x1xi1>
    %67 = vector.broadcast %66 : vector<16x1xi1> to vector<16x8xi1>
    %68 = vector.broadcast %cst_43 : f32 to vector<16x8xf32>
    %69 = arith.select %67, %68, %65 : vector<16x8xi1>, vector<16x8xf32>
    %70 = arith.addf %64, %69 : vector<16x8xf32>
    %c15_i32_44 = arith.constant 15 : i32
    %71 = tpu.dynamic_rotate %61 by %c15_i32_44 dim 0 : vector<16x8xf32>, i32 -> vector<16x8xf32>
    %cst_45 = arith.constant 0.000000e+00 : f32
    %72 = vector.shape_cast %21 : vector<16x1xi1> to vector<16x1xi1>
    %73 = vector.broadcast %72 : vector<16x1xi1> to vector<16x8xi1>
    %74 = vector.broadcast %cst_45 : f32 to vector<16x8xf32>
    %75 = arith.select %73, %74, %71 : vector<16x8xi1>, vector<16x8xf32>
    %76 = arith.addf %70, %75 : vector<16x8xf32>
    %77 = arith.addf %76, %0 : vector<16x8xf32>
    %cst_46 = arith.constant 0.000000e+00 : f32
    %78 = vector.broadcast %cst_46 : f32 to vector<16x8xf32>
    %79 = arith.cmpf ogt, %77, %78 : vector<16x8xf32>
    %cst_47 = arith.constant 0.00999999977 : f32
    %80 = vector.broadcast %cst_47 : f32 to vector<16x8xf32>
    %81 = arith.mulf %80, %77 : vector<16x8xf32>
    %82 = arith.select %79, %77, %81 : vector<16x8xi1>, vector<16x8xf32>
    %c0_48 = arith.constant 0 : index
    %c0_49 = arith.constant 0 : index
    %83 = vector.load %arg4[%c0_48, %c0_49] : memref<16x8xf32, #tpu.memory_space<vmem>>, vector<16x8xf32>
    tpu.vector_store %arg4[%c0_48, %c0_49], %82 {strides = array<i32>} : memref<16x8xf32, #tpu.memory_space<vmem>>, vector<16x8xf32>,
    return
  }
  func.func @transform_0(%arg0: i32) -> (i32, i32) {
    %c0_i32 = arith.constant 0 : i32
    %c0_i32_0 = arith.constant 0 : i32
    return %arg0, %c0_i32 : i32, i32
  }
  func.func @transform_1(%arg0: i32) -> (i32, i32, i32, i32) {
    %c0_i32 = arith.constant 0 : i32
    %c0_i32_0 = arith.constant 0 : i32
    %c0_i32_1 = arith.constant 0 : i32
    %c0_i32_2 = arith.constant 0 : i32
    %c0_i32_3 = arith.constant 0 : i32
    return %c0_i32, %c0_i32_0, %c0_i32_1, %c0_i32_2 : i32, i32, i32, i32
  }
  func.func @transform_2(%arg0: i32) -> (i32, i32) {
    %c0_i32 = arith.constant 0 : i32
    %c0_i32_0 = arith.constant 0 : i32
    %c0_i32_1 = arith.constant 0 : i32
    return %c0_i32, %c0_i32_0 : i32, i32
  }
  func.func @transform_3(%arg0: i32) -> (i32, i32) {
    %c0_i32 = arith.constant 0 : i32
    %c0_i32_0 = arith.constant 0 : i32
    return %arg0, %c0_i32 : i32, i32
  }
}

</mosaic_0001>

<bundles_post_ra>
// kernel: residual_block.1
= control target key start
LH: loop header
LB: loop body
LE: loop exit
PB: predicated region body
PF: predicated region fallthrough
CT: control target
= control target key end

     0   :  { %s509_s12 = smov 0   ;;  %s603_s0 = inlined_call_operand.vmem [shape: f32[32,8], index: 0, kind: input, shape index: {}]   ;;  %s604_s1 = inlined_call_operand.vmem [shape: bf16[2,3,8,8], index: 1, kind: input, shape index: {}]   ;;  %s605_s2 = inlined_call_operand.vmem [shape: f32[2,8], index: 2, kind: input, shape index: {}]   ;;  %s606_s3 = inlined_call_operand.vmem [shape: f32[32,8], index: 3, kind: output, shape index: {}]  }
   0x1 LB: > { %s449_s13 = sadd.s32 4294967295, %s487_s12   ;;  %p453_p0 = scmp.ge.s32.totalorder %s487_s12, 1  ;;  %s487_s12 = sphi %s509_s12, %s13_s12  }
   0x2   : > { %p138_p1 = scmp.lt.s32.totalorder %s487_s12, 3 }
   0x4   : > { %p139_p2 = pnand %p453_p0, %p138_p1 }
   0x5   : > { %s454_s18 = sshll.u32 (!%p139_p2), %s449_s13, 1 }
   0x6   : > { %142 = sbr.rel (%p139_p2) target bundleno = 323 (0x143), region = 32  ;;  %p163_p3 = scmp.lt.s32.totalorder (!%p139_p2), %s454_s18, 3 }
   0xb   : > { %v209_v0 = vld [vmem:[%s604_s1] sm:$0xf]  ;;  %vm214_vm0 = vcmask 1043456   ;;  %v460_v1 = vld [vmem:[%s604_s1 + $0x8] sm:$0xf]  ;;  %s612_s18 = smov (!%p163_p3, %s454_s18), 3  ;;  %v177_v15 = vlaneseq }
   0xc   : > { %v216_v2 = vsel %vm214_vm0, %v209_v0, 0  ;;  %v237_v3 = vsel %vm214_vm0, %v460_v1, 0  ;;  %v459_v4 = vld [vmem:[%s604_s1 + $0x4] sm:$0xf]  ;;  %s455_s21 = sshll.u32 %s612_s18, 3  ;;  %vm210_vm1 = vcmask 64512  }
   0xd   : > { %225 = vmatpush.bf16.msra.mxu0 %v216_v2  ;;  %246 = vmatpush.bf16.msra.mxu1 %v237_v3  ;;  %v256_v5 = vsel %vm214_vm0, %v459_v4, 0  ;;  %s166_s24 = scalar_lea.vmem %s603_s0, %s455_s21  ;;  %v466_v9 = vld [vmem:[%s604_s1 + $0x14] sm:$0xf]  ;;  %v465_v10 = vld [vmem:[%s604_s1 + $0x10] sm:$0xf]  ;;  %v178_v18 = vshrl.u32 %v177_v15, 7  ;;  %s172_s10 = scalar_lea.vmem %s606_s3, %s455_s21 }
   0xe   : > { %265 = vmatpush.bf16.msra.mxu2 %v256_v5  ;;  %v537_v6 = vld [vmem:[%s166_s24] sm:$0xff]  ;;  %v539_v7 = vld [vmem:[%s166_s24 + $0x8] sm:$0xff]  ;;  %v332_v12 = vsel %vm214_vm0, %v466_v9, 0  ;;  %v351_v13 = vsel %vm214_vm0, %v465_v10, 0 }
   0xf   : > { %v208_v8 = vpack.c.bf16 %v539_v7, %v537_v6  ;;  %v463_v11 = vld [vmem:[%s604_s1 + $0xc] sm:$0xf]  ;;  %v184_v19 = vand.u32 15, %v178_v18  ;;  %v479_v20 = vld [vmem:[%s605_s2] ss:$0 sm:$0xff]  ;;  %vm274_vm2 = vcmp.lt.s32.totalorder %v178_v18, 1 }
  0x10   : > { %v311_v14 = vsel %vm214_vm0, %v463_v11, 0  ;;  %v179_v24 = vadd.s32 8, %v178_v18  ;;  %vm287_vm4 = vcmp.lt.s32.totalorder %v178_v18, 7  ;;  %v480_v55 = vld [vmem:[%s605_s2 + $0x1] ss:$0 sm:$0xff] }
  0x11   : > { %458 = vmatmul.msk.bf16.vlgmr.msra.gmra.mxu0 %vm210_vm1, %v208_v8  ;;  %461 = vmatmul.msk.bf16.vlgmr.msra.gmra.mxu1 %vm210_vm1, %v208_v8  ;;  %vm561_vm3 = vcmp.eq.s32.totalorder %v184_v19, 0 }
  0x12   : > { %462 = vmatmul.msk.bf16.vlgmr.msra.gmra.mxu2 %vm210_vm1, %v208_v8  ;;  %341 = vmatpush.bf16.msrb.mxu0 %v332_v12  ;;  %v191_v32 = vand.u32 15, %v179_v24 }
  0x13   : > { %360 = vmatpush.bf16.msrb.mxu1 %v351_v13  ;;  %320 = vmatpush.bf16.msra.mxu3 %v311_v14 }
  0x14   : > { %vm570_vm5 = vcmp.eq.s32.totalorder %v191_v32, 15 }
  0x8e   : > { %v227_v16 = vpop.f32.mrf.mxu0  ;;  %v248_v17 = vpop.f32.mrf.mxu1 }
  0x8f   : > { %v272_v25 = vrot.slane %v227_v16, 7  ;;  %v285_v33 = vrot.slane %v248_v17, 1 }
  0x95   : > { %v267_v21 = vpop.f32.mrf.mxu2 }
  0x96   : > { %v229_v22 = vpop.f32.mrf.mxu0  ;;  %v250_v23 = vpop.f32.mrf.mxu1  ;;  %v268_v28 = vadd.f32 %v479_v20, %v267_v21 }
  0x97   : > { %v273_v27 = vrot.slane %v229_v22, 7  ;;  %v286_v30 = vrot.slane %v250_v23, 1 }
  0x99   : > { %v276_v29 = vsel %vm274_vm2, %v273_v27, %v272_v25  ;;  %v288_v35 = vsel %vm287_vm4, %v285_v33, %v286_v30  ;;  %v289_v37 = vsel %vm287_vm4, %v286_v30, %v285_v33  ;;  %v275_v41 = vsel %vm274_vm2, %v272_v25, %v273_v27 }
  0x9a   : > { %v281_v31 = vsel %vm561_vm3, 0.0, %v276_v29  ;;  %v295_v43 = vsel %vm570_vm5, 0.0, %v289_v37 }
  0x9b   : > { %v283_v34 = vadd.f32 %v281_v31, %v268_v28 }
  0x9d   : > { %v269_v36 = vpop.f32.mrf.mxu2  ;;  %v296_v38 = vadd.f32 %v288_v35, %v283_v34 }
  0x9e   : > { %v270_v40 = vadd.f32 %v479_v20, %v269_v36 }
  0x9f   : > { %v300_v45 = vmul.f32 0.01, %v296_v38  ;;  %vm298_vm6 = vcmp.gt.f32.partialorder %v296_v38, 0.0 }
  0xa0   : > { %v284_v42 = vadd.f32 %v275_v41, %v270_v40 }
  0xa1   : > { %v302_v47 = vsel %vm298_vm6, %v296_v38, %v300_v45 }
  0xa2   : > { %v297_v44 = vadd.f32 %v295_v43, %v284_v42 }
  0xa4   : > { %v301_v46 = vmul.f32 0.01, %v297_v44  ;;  %vm299_vm7 = vcmp.gt.f32.partialorder %v297_v44, 0.0 }
  0xa6   : > { %v303_v48 = vsel %vm299_vm7, %v297_v44, %v301_v46 }
  0xa7   : > { %v304_v49 = vpack.c.bf16 %v303_v48, %v302_v47 }
  0xa9   : > { %464 = vmatmul.msk.bf16.vlgmr.msra.gmra.mxu3 %vm210_vm1, %v304_v49  ;;  %467 = vmatmul.msk.bf16.vlgmr.msrb.gmra.mxu0 %vm210_vm1, %v304_v49 }
  0xaa   : > { %468 = vmatmul.msk.bf16.vlgmr.msrb.gmra.mxu1 %vm210_vm1, %v304_v49 }
 0x126   : > { %v343_v50 = vpop.f32.mrf.mxu0 }
 0x127   : > { %v362_v51 = vpop.f32.mrf.mxu1  ;;  %v375_v57 = vrot.slane %v343_v50, 1 }
 0x128   : > { %v363_v63 = vadd.f32 %v480_v55, %v362_v51 }
 0x12c   : > { %v322_v52 = vpop.f32.mrf.mxu3 }
 0x12d   : > { %v367_v59 = vrot.slane %v322_v52, 7 }
 0x12e   : > { %v345_v53 = vpop.f32.mrf.mxu0 }
 0x12f   : > { %v376_v54 = vrot.slane %v345_v53, 1  ;;  %v364_v56 = vpop.f32.mrf.mxu1 }
 0x130   : > { %v365_v62 = vadd.f32 %v480_v55, %v364_v56 }
 0x131   : > { %v378_v61 = vsel %vm287_vm4, %v376_v54, %v375_v57  ;;  %v377_v8 = vsel %vm287_vm4, %v375_v57, %v376_v54 }
 0x132   : > { %v380_v4 = vsel %vm570_vm5, 0.0, %v378_v61 }
 0x134   : > { %v324_v58 = vpop.f32.mrf.mxu3 }
 0x135   : > { %v368_v60 = vrot.slane %v324_v58, 7 }
 0x137   : > { %v369_v0 = vsel %vm274_vm2, %v367_v59, %v368_v60  ;;  %v370_v1 = vsel %vm274_vm2, %v368_v60, %v367_v59 }
 0x138   : > { %v371_v2 = vsel %vm561_vm3, 0.0, %v370_v1  ;;  %v374_v3 = vadd.f32 %v369_v0, %v365_v62 }
 0x139   : > { %v373_v5 = vadd.f32 %v371_v2, %v363_v63 }
 0x13a   : > { %v382_v9 = vadd.f32 %v380_v4, %v374_v3 }
 0x13b   : > { %v381_v10 = vadd.f32 %v377_v8, %v373_v5 }
 0x13c   : > { %v384_v11 = vadd.f32 %v382_v9, %v539_v7 }
 0x13d   : > { %v383_v12 = vadd.f32 %v381_v10, %v537_v6 }
 0x13e   : > { %v388_v13 = vmul.f32 0.01, %v384_v11  ;;  %vm386_vm9 = vcmp.gt.f32.partialorder %v384_v11, 0.0 }
 0x13f   : > { %vm385_vm8 = vcmp.gt.f32.partialorder %v383_v12, 0.0  ;;  %v387_v14 = vmul.f32 0.01, %v383_v12 }
 0x140   : > { %v390_v16 = vsel %vm386_vm9, %v384_v11, %v388_v13 }
 0x141   : > { %v389_v15 = vsel %vm385_vm8, %v383_v12, %v387_v14  ;;  %392 = vst.msk [vmem:[%s172_s10 + $0x8] sm:$0xff] %vm210_vm1, %v390_v16 }
 0x142   : > { %391 = vst.msk [vmem:[%s172_s10] sm:$0xff] %vm210_vm1, %v389_v15 }
 0x143 PF: > { %s13_s12 = sadd.s32 1, %s487_s12  }
 0x144   : > { %p10_p4 = scmp.ge.s32.totalorder %s13_s12, 4  }
 0x146   :  { %12 = sbr.rel (!%p10_p4) target bundleno = 1 (0x1), region = 67 }

</bundles_post_ra>
